<compile_context>
chip_gen: v6e
topology: v6e:2x2x1
jax: 0.10.0
libtpu: 0.0.40
codegen_flags: <defaults>
</compile_context>

<pallas_src>
import functools
import random

import numpy as np
import jax
import jax.numpy as jnp
from jax.experimental import pallas as pl
from jax.experimental.pallas import tpu as pltpu

# --------------------------- model dimensions --------------------------------
VOCAB = 32                 # vocabulary size (== f_decoder.output_dim)
EMB   = 32                 # token embedding dim
HID   = 32                 # enc/dec hidden dim (== f_decoder.dec_hid_dim)
NPROF = 4                  # number of candidate profiles
PEMB  = 32                 # profile embedding dim
COND  = PEMB + HID         # decoder conditioning width (profile_v ++ b_rnn_agg)
G3    = 3 * HID            # fused GRU gate width  (r | z | n)
F32   = jnp.float32


def _const_spec(shape):
    """Full-array BlockSpec with a constant block index (resident across the grid)."""
    n = len(shape)
    return pl.BlockSpec(shape, lambda *args, _n=n: (0,) * _n)


# ------------------------------ Pallas kernels --------------------------------
def gru_encoder_kernel(xp_ref, wh_ref, bh_ref, outs_ref, hid_ref):
    """post_encoder recurrence.  grid=(Tx,) sequential; input projection is hoisted
    outside (xp = emb(X) @ [Wir|Wiz|Win] + bi), only h-dependent work is in the loop."""
    t = pl.program_id(0)

    @pl.when(t == 0)
    def _():
        hid_ref[...] = jnp.zeros_like(hid_ref)

    xp = xp_ref[0]                                                   # [B, 3H]
    h = hid_ref[...]                                                 # [B, H]
    hp = jnp.dot(h, wh_ref[...], preferred_element_type=jnp.float32) + bh_ref[...]
    r = jax.nn.sigmoid(xp[:, 0:HID] + hp[:, 0:HID])
    z = jax.nn.sigmoid(xp[:, HID:2 * HID] + hp[:, HID:2 * HID])
    n = jnp.tanh(xp[:, 2 * HID:3 * HID] + r * hp[:, 2 * HID:3 * HID])
    h_new = (1.0 - z) * n + z * h
    hid_ref[...] = h_new
    outs_ref[0] = h_new


def analysis_kernel(enc_ref, yemb_ref, chk_w_ref, chk_b_ref, det_wd_ref, profs_ref,
                    pe_ref, beta_ref, pv_ref, vpos_ref):
    """Fused profile checker + profile detector + position detector (one pass over enc)."""
    summ = jnp.mean(enc_ref[...], axis=0)                            # [B, H]
    # profile checker
    pe_ref[...] = jax.nn.sigmoid(
        jnp.dot(summ, chk_w_ref[...], preferred_element_type=jnp.float32) + chk_b_ref[...])
    # profile detector
    q = jnp.dot(summ, det_wd_ref[...], preferred_element_type=jnp.float32)   # [B, PEMB]
    sc = jax.lax.dot_general(q, profs_ref[...], (((1,), (1,)), ((), ())),
                             preferred_element_type=jnp.float32)             # [B, NPROF]
    beta = jax.nn.softmax(sc, axis=-1)
    beta_ref[...] = beta
    pv = jnp.dot(beta, profs_ref[...], preferred_element_type=jnp.float32)   # [B, PEMB]
    pv_ref[...] = pv
    # position detector: argmax over time of <emb(y_t), profile_v>  (stays on device)
    pos_sc = jnp.sum(yemb_ref[...] * pv[None, :, :], axis=-1)                # [Ty, B]
    Ty = pos_sc.shape[0]
    mx = jnp.max(pos_sc, axis=0, keepdims=True)
    it = jax.lax.broadcasted_iota(jnp.int32, pos_sc.shape, 0)
    vpos = jnp.min(jnp.where(pos_sc >= mx, it, Ty), axis=0)                  # first argmax
    vpos_ref[0] = vpos.astype(jnp.int32)


def decode_seq_kernel(tf_ref,                                   # scalar-prefetch (SMEM)
                      y_ref, vpos_ref, hid0_ref, enc_ref, cond_ref, emb_ref,
                      wa_ref, wemb_ref, wctx_ref, wcond_ref, wh_ref, bi_ref, bh_ref,
                      wo_ref, bo_ref,
                      outs_ref, rnn_ref,                        # outputs
                      hid_s, tok_s,                             # VMEM scratch (resident)
                      *, backward):
    """Whole attention-GRU decode in one grid loop over time.

    Per-lane activation masks are derived in-kernel from v_pos:
      forward : active at t iff v_pos <= t ; backward : active at t iff v_pos >= t.
    A lane that activates at t == v_pos gets token y[t] and hidden post_hid (as in the
    reference's add_mask handling); inactive lanes are frozen/masked, outputs stay 0.
    """
    g = pl.program_id(0)
    T = pl.num_programs(0)
    t = (T - 1 - g) if backward else g                          # backward: t = T-1 .. 0
    B = hid0_ref.shape[0]

    @pl.when(g == 0)
    def _():
        hid_s[...] = hid0_ref[...]
        tok_s[...] = jnp.zeros_like(tok_s)

    vpos = vpos_ref[0]                                           # [B] int32
    y_t = y_ref[0]                                               # [B] int32
    just = vpos == t                                             # newly activated lanes
    active = (vpos >= t) if backward else (vpos <= t)

    # teacher-forcing flag drawn at the previous step (unused at g == 0: all 'just')
    gm1 = jnp.maximum(g - 1, 0)
    tf_prev = tf_ref[gm1] > 0

    prev_tok = tok_s[0]                                          # [B] int32 (prev argmax)
    tok = jnp.where(just | tf_prev, y_t, prev_tok)               # next-input token select
    h_in = jnp.where(just[:, None], hid0_ref[...], hid_s[...])   # reset hid at activation

    # token embedding via one-hot matmul (MXU-friendly, no dynamic gather in-kernel)
    onehot = (tok[:, None] ==
              jax.lax.broadcasted_iota(jnp.int32, (B, VOCAB), 1)).astype(jnp.float32)
    emb = jnp.dot(onehot, emb_ref[...], preferred_element_type=jnp.float32)  # [B, EMB]

    # attention over encoder time axis
    enc = enc_ref[...]                                                       # [Tx, B, H]
    q = jnp.dot(h_in, wa_ref[...], preferred_element_type=jnp.float32)       # [B, H]
    scores = jnp.sum(enc * q[None, :, :], axis=-1)                           # [Tx, B]
    alpha = jax.nn.softmax(scores, axis=0)
    ctx = jnp.sum(enc * alpha[:, :, None], axis=0)                           # [B, H]

    # fused-gate GRU; input built as a sum of row-block matmuls (no concatenate)
    xp = (jnp.dot(emb, wemb_ref[...], preferred_element_type=jnp.float32)
          + jnp.dot(ctx, wctx_ref[...], preferred_element_type=jnp.float32)
          + jnp.dot(cond_ref[...], wcond_ref[...], preferred_element_type=jnp.float32)
          + bi_ref[...])                                                     # [B, 3H]
    hp = jnp.dot(h_in, wh_ref[...], preferred_element_type=jnp.float32) + bh_ref[...]
    r = jax.nn.sigmoid(xp[:, 0:HID] + hp[:, 0:HID])
    z = jax.nn.sigmoid(xp[:, HID:2 * HID] + hp[:, HID:2 * HID])
    n = jnp.tanh(xp[:, 2 * HID:3 * HID] + r * hp[:, 2 * HID:3 * HID])
    h_new = (1.0 - z) * n + z * h_in

    logits = jnp.dot(h_new, wo_ref[...], preferred_element_type=jnp.float32) + bo_ref[...]

    # masked per-step writes (inactive lanes stay zero, as in the reference's outs[t, mask])
    outs_ref[0] = jnp.where(active[:, None], logits, 0.0)
    rnn_ref[0] = jnp.where(active[:, None], h_new, 0.0)

    # resident state update + in-kernel argmax for the next step's token
    hid_s[...] = h_new
    mx = jnp.max(logits, axis=1, keepdims=True)
    vidx = jax.lax.broadcasted_iota(jnp.int32, logits.shape, 1)
    top1 = jnp.min(jnp.where(logits >= mx, vidx, VOCAB), axis=1)             # first argmax
    tok_s[0] = top1.astype(jnp.int32)


# ------------------------------ module wrappers -------------------------------
def post_encoder(params, X):
    p = params['enc']
    x_emb = jnp.take(params['enc_emb'], X, axis=0).astype(F32)               # [Tx, B, EMB]
    # hoisted input projection: one big matmul outside the recurrence
    xproj = jnp.dot(x_emb, p['wi']) + p['bi']                                # [Tx, B, 3H]
    Tx, B, _ = xproj.shape

    outs, hid = pl.pallas_call(
        gru_encoder_kernel,
        out_shape=(jax.ShapeDtypeStruct((Tx, B, HID), F32),
                   jax.ShapeDtypeStruct((B, HID), F32)),
        grid_spec=pltpu.PrefetchScalarGridSpec(
            num_scalar_prefetch=0,
            grid=(Tx,),
            in_specs=[pl.BlockSpec((1, B, G3), lambda t, *_: (t, 0, 0)),
                      _const_spec((HID, G3)),
                      _const_spec((1, G3))],
            out_specs=[pl.BlockSpec((1, B, HID), lambda t, *_: (t, 0, 0)),
                       _const_spec((B, HID))]),
        compiler_params=pltpu.CompilerParams(dimension_semantics=("arbitrary",)),
    )(xproj, p['wh'], p['bh'])
    return outs, hid


def analyze(params, post_outs, y, profiles):
    """Fused profile_checker / profile_detector / position_detector (one pallas_call)."""
    B = post_outs.shape[1]
    yemb = jnp.take(params['profile_emb'], y, axis=0).astype(F32)            # [Ty, B, PEMB]
    pe, beta, pv, vpos = pl.pallas_call(
        analysis_kernel,
        out_shape=(jax.ShapeDtypeStruct((B, 1), F32),
                   jax.ShapeDtypeStruct((B, NPROF), F32),
                   jax.ShapeDtypeStruct((B, PEMB), F32),
                   jax.ShapeDtypeStruct((1, B), jnp.int32)),
    )(post_outs, yemb, params['chk_w'], params['chk_b'], params['det_wd'], profiles)
    return pe, beta, pv, vpos


def decode_seq(dp, dec_emb, y, vpos, hid0, enc, cond, tf_flags, *, backward):
    """One pallas_call for a whole decode (naive / backward / forward)."""
    T, B = y.shape
    Tx = enc.shape[0]
    kernel = functools.partial(decode_seq_kernel, backward=backward)
    outs, rnn = pl.pallas_call(
        kernel,
        out_shape=(jax.ShapeDtypeStruct((T, B, VOCAB), F32),
                   jax.ShapeDtypeStruct((T, B, HID), F32)),
        grid_spec=pltpu.PrefetchScalarGridSpec(
            num_scalar_prefetch=1,                       # teacher-forcing flags -> SMEM
            grid=(T,),
            in_specs=[
                pl.BlockSpec((1, B), lambda g, *_: (g, 0)),     # y tokens of step t
                _const_spec((1, B)),                            # v_pos (int32, on device)
                _const_spec((B, HID)),                          # post_hid
                _const_spec((Tx, B, HID)),                      # encoder memory (resident)
                _const_spec((B, COND)),                         # conditioning vector
                _const_spec((VOCAB, EMB)),                      # decoder embedding table
                _const_spec((HID, HID)),                        # wa
                _const_spec((EMB, G3)),                         # w_emb
                _const_spec((HID, G3)),                         # w_ctx
                _const_spec((COND, G3)),                        # w_cond
                _const_spec((HID, G3)),                         # w_h
                _const_spec((1, G3)),                           # b_i
                _const_spec((1, G3)),                           # b_h
                _const_spec((HID, VOCAB)),                      # w_o
                _const_spec((1, VOCAB)),                        # b_o
            ],
            out_specs=[pl.BlockSpec((1, B, VOCAB), lambda g, *_: (g, 0, 0)),
                       pl.BlockSpec((1, B, HID), lambda g, *_: (g, 0, 0))],
            scratch_shapes=[pltpu.VMEM((B, HID), F32),          # resident hidden state
                            pltpu.VMEM((1, B), jnp.int32)]),    # previous argmax token
        compiler_params=pltpu.CompilerParams(dimension_semantics=("arbitrary",)),
    )(tf_flags, y, vpos, hid0, enc, cond, dec_emb,
      dp['wa'], dp['wemb'], dp['wctx'], dp['wcond'], dp['wh'], dp['bi'], dp['bh'],
      dp['wo'], dp['bo'])
    return outs, rnn


# ------------------------------ PCCM forward -----------------------------------
def pccm_forward(params, X, y, y_lens, profiles, early_stage=False,
                 teacher_forcing_ratio=0.5, seed=0):
    del y_lens  # only the early_stage branch of the reference uses y_lens
    # TODO(synk): early_stage branch (random bi_decode / random v_pos) not implemented;
    # this implements the main (else) branch of the reference forward.
    pyrng = random.Random(seed)   # deterministic stand-in for torch's random.random()
    ret = []
    T_y, B = y.shape

    post_outs, post_hid = post_encoder(params, X)
    pe, beta, profile_v, vpos = analyze(params, post_outs, y, profiles)
    profile_exists = pe[:, 0]                                    # [B]

    # single host sync, needed to mirror the reference's data-dependent branch structure
    pe_np = np.asarray(profile_exists)
    no_mask_np = pe_np <= 0.5
    has_mask_np = pe_np > 0.5

    def tf_flags():  # per-step teacher-forcing draws (host RNG, as in the reference)
        return jnp.asarray(
            [1 if pyrng.random() < teacher_forcing_ratio else 0 for _ in range(T_y)],
            dtype=jnp.int32)

    # ---- naive forward decode (no-profile lanes); full batch, subset lanes at the end
    outs = None
    if no_mask_np.sum() > 0:
        nidx = jnp.asarray(np.where(no_mask_np)[0])
        zero_vpos = jnp.zeros((1, B), jnp.int32)                 # all lanes start at t=0
        cond0 = jnp.zeros((B, COND), F32)                        # naive: no conditioning
        n_outs, _ = decode_seq(params['naive'], params['dec_emb'], y, zero_vpos,
                               post_hid, post_outs, cond0, tf_flags(), backward=False)
        outs = n_outs[:, nidx]
    ret.append([outs, None, None, None])

    # ---- has-profile path: backward decode from v_pos to 0, then forward from v_pos
    # NOTE(v7x): the naive and b/f decode calls are dispatched without intervening host
    # syncs, so XLA may overlap them; an explicit 2-TC split is a possible further win.
    b_outs = f_outs = beta_r = vpos_r = None
    if has_mask_np.sum() > 0:
        hidx = jnp.asarray(np.where(has_mask_np)[0])
        cond_b = jnp.concatenate([profile_v, jnp.zeros((B, HID), F32)], axis=-1)
        b_full, b_rnn = decode_seq(params['bdec'], params['dec_emb'], y, vpos,
                                   post_hid, post_outs, cond_b, tf_flags(), backward=True)
        b_agg = b_rnn.sum(axis=0)                                # [B, HID]
        cond_f = jnp.concatenate([profile_v, b_agg], axis=-1)
        f_full, _ = decode_seq(params['fdec'], params['dec_emb'], y, vpos,
                               post_hid, post_outs, cond_f, tf_flags(), backward=False)
        b_outs = b_full[:, hidx]
        f_outs = f_full[:, hidx]
        beta_r = beta[hidx]
        vpos_r = vpos[0, hidx]
    ret.append([f_outs, b_outs, beta_r, vpos_r])

    no_profile_mask = profile_exists <= 0.5
    has_profile_mask = profile_exists > 0.5
    return ret, profile_exists, no_profile_mask, has_profile_mask


# ------------------------------ parameter init ---------------------------------
def _nrm(key, shape, scale=0.1):
    return (scale * jax.random.normal(key, shape)).astype(F32)


def init_params(key):
    ks = iter(jax.random.split(key, 64))

    def gru_enc():
        return dict(wi=_nrm(next(ks), (EMB, G3)), wh=_nrm(next(ks), (HID, G3)),
                    bi=_nrm(next(ks), (1, G3)), bh=_nrm(next(ks), (1, G3)))

    def decoder():
        return dict(wa=_nrm(next(ks), (HID, HID)),
                    wemb=_nrm(next(ks), (EMB, G3)), wctx=_nrm(next(ks), (HID, G3)),
                    wcond=_nrm(next(ks), (COND, G3)), wh=_nrm(next(ks), (HID, G3)),
                    bi=_nrm(next(ks), (1, G3)), bh=_nrm(next(ks), (1, G3)),
                    wo=_nrm(next(ks), (HID, VOCAB)), bo=_nrm(next(ks), (1, VOCAB)))

    return dict(
        enc_emb=_nrm(next(ks), (VOCAB, EMB)),
        dec_emb=_nrm(next(ks), (VOCAB, EMB)),
        profile_emb=_nrm(next(ks), (VOCAB, PEMB)),
        enc=gru_enc(),
        chk_w=_nrm(next(ks), (HID, 1), 1.0),
        chk_b=jnp.full((1, 1), 0.1, F32),
        det_wd=_nrm(next(ks), (HID, PEMB)),
        naive=decoder(),
        bdec=decoder(),
        fdec=decoder(),
    )


# ----------------------------------- main ---------------------------------------
if __name__ == "__main__":
    key = jax.random.PRNGKey(0)
    kp, kx, ky, kpr = jax.random.split(key, 4)
    params = init_params(kp)

    Tx, Ty, B = 8, 8, 4
    X = jax.random.randint(kx, (Tx, B), 0, VOCAB, dtype=jnp.int32)   # post tokens
    y = jax.random.randint(ky, (Ty, B), 0, VOCAB, dtype=jnp.int32)   # response tokens
    y_lens = [Ty] * B
    profiles = _nrm(kpr, (NPROF, PEMB), 1.0)

    result = pccm_forward(params, X, y, y_lens, profiles,
                          early_stage=False, teacher_forcing_ratio=0.5)
    jax.block_until_ready(jax.tree_util.tree_leaves(result))
    print("KERNEL_OK")
</pallas_src>

<mosaic_0001>
module attributes {stable_mosaic.version = 11 : i64} {
  func.func @gru_encoder_kernel(%arg0: i32, %arg1: memref<1x4x96xf32, #tpu.memory_space<vmem>>, %arg2: memref<32x96xf32, #tpu.memory_space<vmem>>, %arg3: memref<1x96xf32, #tpu.memory_space<vmem>>, %arg4: memref<1x4x32xf32, #tpu.memory_space<vmem>>, %arg5: memref<4x32xf32, #tpu.memory_space<vmem>>) attributes {dimension_semantics = [#tpu.dimension_semantics<arbitrary>], iteration_bounds = array<i64: 8>, scalar_prefetch = 0 : i64, scratch_operands = 0 : i64, tpu.core_type = #tpu.core_type<tc>, window_params = [{transform_indices = @transform_0, window_bounds = array<i64: 1, 4, 96>}, {pipeline_mode = #tpu.pipeline_mode<synchronous>, transform_indices = @transform_1, window_bounds = array<i64: 32, 96>}, {pipeline_mode = #tpu.pipeline_mode<synchronous>, transform_indices = @transform_2, window_bounds = array<i64: 1, 96>}, {transform_indices = @transform_3, window_bounds = array<i64: 1, 4, 32>}, {pipeline_mode = #tpu.pipeline_mode<synchronous>, transform_indices = @transform_4, window_bounds = array<i64: 4, 32>}]} {
    %c0_i32 = arith.constant 0 : i32
    %0 = arith.cmpi eq, %arg0, %c0_i32 : i32
    %1 = arith.extui %0 : i1 to i32
    %c0_i32_0 = arith.constant 0 : i32
    %2 = arith.cmpi ne, %1, %c0_i32_0 : i32
    scf.if %2 {
      %cst_17 = arith.constant 0.000000e+00 : f32
      %41 = vector.broadcast %cst_17 : f32 to vector<4x32xf32>
      %c0_18 = arith.constant 0 : index
      %c0_19 = arith.constant 0 : index
      %42 = vector.load %arg5[%c0_18, %c0_19] : memref<4x32xf32, #tpu.memory_space<vmem>>, vector<4x32xf32>
      tpu.vector_store %arg5[%c0_18, %c0_19], %41 {strides = array<i32>} : memref<4x32xf32, #tpu.memory_space<vmem>>, vector<4x32xf32>,
    } else {
    }
    %c0 = arith.constant 0 : index
    %c0_1 = arith.constant 0 : index
    %c0_2 = arith.constant 0 : index
    %3 = vector.load %arg1[%c0, %c0_1, %c0_2] : memref<1x4x96xf32, #tpu.memory_space<vmem>>, vector<1x4x96xf32>
    %4 = vector.shape_cast %3 : vector<1x4x96xf32> to vector<4x96xf32>
    %c0_3 = arith.constant 0 : index
    %c0_4 = arith.constant 0 : index
    %5 = vector.load %arg5[%c0_3, %c0_4] : memref<4x32xf32, #tpu.memory_space<vmem>>, vector<4x32xf32>
    %c0_5 = arith.constant 0 : index
    %c0_6 = arith.constant 0 : index
    %6 = vector.load %arg2[%c0_5, %c0_6] : memref<32x96xf32, #tpu.memory_space<vmem>>, vector<32x96xf32>
    %cst = arith.constant dense<0.000000e+00> : vector<4x96xf32>
    %7 = tpu.matmul %5, %6, %cst {dimension_numbers = #tpu.dot_dimension_numbers<[1], [0], [0], [1], [0, 0, 1, 1], [], []>} : vector<4x32xf32>, vector<32x96xf32>, vector<4x96xf32> -> vector<4x96xf32>
    %c0_7 = arith.constant 0 : index
    %c0_8 = arith.constant 0 : index
    %8 = vector.load %arg3[%c0_7, %c0_8] : memref<1x96xf32, #tpu.memory_space<vmem>>, vector<1x96xf32>
    %9 = vector.broadcast %8 : vector<1x96xf32> to vector<4x96xf32>
    %10 = arith.addf %7, %9 : vector<4x96xf32>
    %11 = vector.extract_strided_slice %4 {offsets = [0, 0], sizes = [4, 32], strides = [1, 1]} : vector<4x96xf32> to vector<4x32xf32>
    %12 = vector.extract_strided_slice %10 {offsets = [0, 0], sizes = [4, 32], strides = [1, 1]} : vector<4x96xf32> to vector<4x32xf32>
    %13 = arith.addf %11, %12 : vector<4x32xf32>
    %14 = arith.negf %13 : vector<4x32xf32>
    %15 = math.exp %14 : vector<4x32xf32>
    %cst_9 = arith.constant 1.000000e+00 : f32
    %16 = vector.broadcast %cst_9 : f32 to vector<4x32xf32>
    %17 = arith.addf %16, %15 : vector<4x32xf32>
    %18 = arith.divf %16, %17 : vector<4x32xf32>
    %19 = vector.extract_strided_slice %4 {offsets = [0, 32], sizes = [4, 32], strides = [1, 1]} : vector<4x96xf32> to vector<4x32xf32>
    %20 = vector.extract_strided_slice %10 {offsets = [0, 32], sizes = [4, 32], strides = [1, 1]} : vector<4x96xf32> to vector<4x32xf32>
    %21 = arith.addf %19, %20 : vector<4x32xf32>
    %22 = arith.negf %21 : vector<4x32xf32>
    %23 = math.exp %22 : vector<4x32xf32>
    %cst_10 = arith.constant 1.000000e+00 : f32
    %24 = vector.broadcast %cst_10 : f32 to vector<4x32xf32>
    %25 = arith.addf %24, %23 : vector<4x32xf32>
    %26 = arith.divf %24, %25 : vector<4x32xf32>
    %27 = vector.extract_strided_slice %4 {offsets = [0, 64], sizes = [4, 32], strides = [1, 1]} : vector<4x96xf32> to vector<4x32xf32>
    %28 = vector.extract_strided_slice %10 {offsets = [0, 64], sizes = [4, 32], strides = [1, 1]} : vector<4x96xf32> to vector<4x32xf32>
    %29 = arith.mulf %18, %28 : vector<4x32xf32>
    %30 = arith.addf %27, %29 : vector<4x32xf32>
    %31 = math.tanh %30 : vector<4x32xf32>
    %cst_11 = arith.constant 1.000000e+00 : f32
    %32 = vector.broadcast %cst_11 : f32 to vector<4x32xf32>
    %33 = arith.subf %32, %26 : vector<4x32xf32>
    %34 = arith.mulf %33, %31 : vector<4x32xf32>
    %35 = arith.mulf %26, %5 : vector<4x32xf32>
    %36 = arith.addf %34, %35 : vector<4x32xf32>
    %c0_12 = arith.constant 0 : index
    %c0_13 = arith.constant 0 : index
    %37 = vector.load %arg5[%c0_12, %c0_13] : memref<4x32xf32, #tpu.memory_space<vmem>>, vector<4x32xf32>
    tpu.vector_store %arg5[%c0_12, %c0_13], %36 {strides = array<i32>} : memref<4x32xf32, #tpu.memory_space<vmem>>, vector<4x32xf32>,
    %c0_14 = arith.constant 0 : index
    %c0_15 = arith.constant 0 : index
    %c0_16 = arith.constant 0 : index
    %38 = vector.load %arg4[%c0_14, %c0_15, %c0_16] : memref<1x4x32xf32, #tpu.memory_space<vmem>>, vector<1x4x32xf32>
    %39 = vector.shape_cast %38 : vector<1x4x32xf32> to vector<4x32xf32>
    %40 = vector.shape_cast %36 : vector<4x32xf32> to vector<1x4x32xf32>
    tpu.vector_store %arg4[%c0_14, %c0_15, %c0_16], %40 {strides = array<i32>} : memref<1x4x32xf32, #tpu.memory_space<vmem>>, vector<1x4x32xf32>,
    return
  }
  func.func @transform_0(%arg0: i32) -> (i32, i32, i32) {
    %c0_i32 = arith.constant 0 : i32
    %c0_i32_0 = arith.constant 0 : i32
    %c0_i32_1 = arith.constant 0 : i32
    return %arg0, %c0_i32, %c0_i32_0 : i32, i32, i32
  }
  func.func @transform_1(%arg0: i32) -> (i32, i32) {
    %c0_i32 = arith.constant 0 : i32
    %c0_i32_0 = arith.constant 0 : i32
    %c0_i32_1 = arith.constant 0 : i32
    return %c0_i32, %c0_i32_0 : i32, i32
  }
  func.func @transform_2(%arg0: i32) -> (i32, i32) {
    %c0_i32 = arith.constant 0 : i32
    %c0_i32_0 = arith.constant 0 : i32
    %c0_i32_1 = arith.constant 0 : i32
    return %c0_i32, %c0_i32_0 : i32, i32
  }
  func.func @transform_3(%arg0: i32) -> (i32, i32, i32) {
    %c0_i32 = arith.constant 0 : i32
    %c0_i32_0 = arith.constant 0 : i32
    %c0_i32_1 = arith.constant 0 : i32
    return %arg0, %c0_i32, %c0_i32_0 : i32, i32, i32
  }
  func.func @transform_4(%arg0: i32) -> (i32, i32) {
    %c0_i32 = arith.constant 0 : i32
    %c0_i32_0 = arith.constant 0 : i32
    %c0_i32_1 = arith.constant 0 : i32
    return %c0_i32, %c0_i32_0 : i32, i32
  }
}

</mosaic_0001>

<bundles_post_ra>
// kernel: tpu_custom_call.1
= control target key start
LH: loop header
LB: loop body
LE: loop exit
PB: predicated region body
PF: predicated region fallthrough
CT: control target
= control target key end

     0   :  { %10 = vsyncpa [#allocation3], 0  ;;  %s970_s0 = inlined_call_operand.hbm [shape: f32[8,4,96], index: 0, kind: input, shape index: {}]   ;;  %s971_s1 = inlined_call_operand.hbm [shape: f32[32,96], index: 1, kind: input, shape index: {}]   ;;  %s972_s2 = inlined_call_operand.vmem [shape: f32[1,96], index: 2, kind: input, shape index: {}]   ;;  %s973_s3 = inlined_call_operand.hbm [shape: f32[8,4,32], index: 3, kind: output, shape index: {0}]   ;;  %s974_s4 = inlined_call_operand.hbm [shape: f32[4,32], index: 4, kind: output, shape index: {1}]  }
   0x1   :  { %12 = vsyncpa [#allocation3 + $0x1], 0 }
   0x2   :  { %13 = vsyncpa [#allocation6], 0 }
   0x3   :  { %14 = vsyncpa [#allocation4], 0 }
   0x4   :  { %16 = vsyncpa [#allocation4 + $0x1], 0 }
   0x5   :  { %17 = vsyncpa [#allocation9], 0  ;;  %s775_s15 = smov 0   ;;  %s777_s16 = smov 0  }
   0x6   :  { %s779_s17 = smov 0   ;;  %s781_s18 = smov 0  }
   0x7 LB: > { %s796_s19 = sadd.s32 4294967295, %s736_s18   ;;  %s472_s20 = sadd.s32 4294967294, %s736_s18   ;;  %s736_s18 = sphi %s781_s18, %s1000_s18   ;;  %s732_s17 = sphi %s779_s17, %s999_s17   ;;  %s728_s16 = sphi %s777_s16, %s998_s16   ;;  %s724_s15 = sphi %s775_s15, %s997_s15  }
   0x8   : > { %p43_p0 = scmp.ne.s32.totalorder %s728_s16, %s724_s15  ;;  %p975_p1 = scmp.eq.s32.totalorder %s796_s19, 0 }
   0x9   : > { %p115_p3 = scmp.eq.s32.totalorder %s472_s20, 7  ;;  %p473_p5 = scmp.ge.s32.totalorder %s736_s18, 1 }
   0xa   : > { %p805_p4 = por %p975_p1, %p43_p0  ;;  %p143_p7 = scmp.lt.s32.totalorder %s736_s18, 9 }
   0xb   : > { %p810_p6 = por %p115_p3, %p43_p0  ;;  %s738_s24 = smov [#allocation5]  }
   0xc   : > { %s979_s21 = scalar_select %p805_p4, 1, 0 }
   0xd   : > { %s980_s22 = scalar_select %p810_p6, 1, 0 }
   0xe   : > { %p816_p9 = pnand %p473_p5, %p143_p7  ;;  %s155_s25 = sshll.u32 %s738_s24, 4  ;;  %s156_s25 = int_to_ptr.vmem [resolvable:$true] %s155_s25 }
   0xf   : > { %s829_s27 = sadd.s32 1, %s736_s18   ;;  %s30_s28 = sadd.s32 1, %s732_s17 }
  0x10   : > { %s981_s23 = scalar_select %p816_p9, 1, 0 }
  0x11   : > { %p520_p10 = pneg %p816_p9  ;;  %s27_s29 = ssub.s32 %s736_s18, %s829_s27 }
  0x12   : > { %s597_s30 = scalar_lea.vmem %s156_s25, 512  ;;  %p605_p5 = scmp.lt.s32.totalorder %s156_s25, %s156_s25 }
  0x13   : > { %p824_p11 = pnand %p520_p10, %p975_p1  ;;  %p598_p13 = scmp.ne.s32.totalorder %s156_s25, %s597_s30 }
  0x14   : > { %p606_p7 = scmp.lt.s32.totalorder %s597_s30, %s597_s30 }
  0x15   : > { %p588_p12 = pneg %p824_p11 }
  0x16   : > { %p607_p8 = por %p606_p7, %p605_p5 }
  0x17   : > { %p600_p0 = pnand %p598_p13, %p588_p12 }
  0x19   : > { %p601_p3 = pneg %p600_p0 }
  0x1b   : > { %p608_p2 = pnand %p607_p8, %p601_p3 }
  0x1d   : > { %611 = shalt.err (!%p608_p2)
}
  0x1e   : > { %s739_s5 = smov 128   ;;  %s740_s6 = smov 8  }
  0x1f   : > { %523 = dma.hbm_to_vmem [thread:$0]  (!%p824_p11), %s971_s1, 512, %s156_s25, [#allocation6], %s739_s5, %s739_s5, %s740_s6  }
  0x20   : > { %p28_p10 = scmp.eq.s32.totalorder %s27_s29, 0  ;;  %p37_p12 = scmp.ne.s32.totalorder %s732_s17, %s728_s16 }
  0x21   : > { %p38_p8 = scmp.eq.s32.totalorder %s736_s18, 0  ;;  %p533_p2 = scmp.lt.s32.totalorder %s736_s18, 8 }
  0x22   : > { %s846_s9 = scalar_select %p28_p10, %s732_s17, %s30_s28  }
  0x23   : > { %p39_p13 = por %p38_p8, %p37_p12  ;;  %p983_p0 = scmp.eq.s32.totalorder %s796_s19, 7 }
  0x24   : > { %s172_s11 = sand.u32 1, %s732_s17   ;;  %s477_s12 = sshll.u32 %s736_s18, 6 }
  0x25   : > { %p850_p3 = por %p983_p0, %p37_p12  ;;  %s476_s13 = sshll.u32 %s172_s11, 2 }
  0x26   : > { %s859_s24 = scalar_lea.hbm %s970_s0, %s477_s12  ;;  %s176_s25 = scalar_lea.vmem [#allocation2], %s476_s13 }
  0x27   : > { %s984_s10 = scalar_select %p850_p3, 1, 0 }
  0x28   : > { %s183_s26 = sshll.u32 %s176_s25, 4  ;;  %p861_p11 = pnand %p533_p2, %p39_p13  ;;  %s184_s26 = int_to_ptr.vmem [resolvable:$true] %s183_s26 }
  0x29   : > { %s173_s29 = scalar_lea.sflag [#allocation3], %s172_s11  ;;  %s612_s30 = scalar_lea.hbm %s859_s24, 64 }
  0x2a   : > { %p613_p5 = scmp.ne.s32.totalorder %s859_s24, %s612_s30  ;;  %p614_p7 = pneg %p861_p11 }
  0x2b   : > { %s617_s7 = scalar_lea.hbm %s970_s0, 512  ;;  %p618_p8 = scmp.lt.s32.totalorder %s859_s24, %s970_s0 }
  0x2c   : > { %p615_p10 = pnand %p614_p7, %p613_p5  ;;  %p619_p2 = scmp.lt.s32.totalorder %s617_s7, %s612_s30 }
  0x2e   : > { %p616_p12 = pneg %p615_p10  ;;  %p620_p13 = por %p619_p2, %p618_p8 }
  0x30   : > { %p621_p0 = pnand %p620_p13, %p616_p12 }
  0x32   : > { %624 = shalt.err (!%p621_p0)
}
  0x33   : > { %s625_s13 = scalar_lea.vmem %s184_s26, 64  ;;  %s741_s11 = smov [#allocation2]  }
  0x34   : > { %p626_p1 = scmp.ne.s32.totalorder %s184_s26, %s625_s13  ;;  %s630_s14 = sshll.u32 %s741_s11, 4  ;;  %s631_s14 = int_to_ptr.vmem [resolvable:$false] %s630_s14 }
  0x35   : > { %s632_s20 = scalar_lea.vmem %s631_s14, 128  ;;  %p633_p5 = scmp.lt.s32.totalorder %s184_s26, %s631_s14 }
  0x36   : > { %p628_p6 = pnand %p626_p1, %p614_p7  ;;  %p634_p10 = scmp.lt.s32.totalorder %s632_s20, %s625_s13 }
  0x38   : > { %p629_p3 = pneg %p628_p6  ;;  %p635_p4 = por %p634_p10, %p633_p5 }
  0x3a   : > { %p636_p9 = pnand %p635_p4, %p629_p3 }
  0x3c   : > { %639 = shalt.err (!%p636_p9)
}
  0x3d   : > { %527 = dma.hbm_to_vmem [thread:$0]  (!%p861_p11), %s859_s24, 64, %s184_s26, %s173_s29  }
  0x3e   : > { %p986_p12 = scmp.ne.s32.totalorder %s981_s23, 0 }
  0x3f   : > { %s882_s25 = sand.u32 (!%p986_p12), 1, %s728_s16   ;;  %p987_p1 = scmp.ne.s32.totalorder (!%p986_p12), %s979_s21, 0 }
  0x40   : > { %192 = sbr.rel (%p986_p12) target bundleno = 802 (0x322), region = 32  ;;  %s479_s30 = sshll.u32 (!%p986_p12), %s882_s25, 2 }
  0x41   : > { %s195_s5 = scalar_lea.sflag (!%p986_p12), [#allocation3], %s882_s25  ;;  %s886_s6 = scalar_lea.vmem (!%p986_p12), [#allocation2], %s479_s30 }
  0x45   : > { %707 = dma.done.wait (%p987_p1), %s195_s5, 64  }
  0x46   : > { %709 = vsyncadd (%p987_p1), %s195_s5, 4294967232  ;;  %p988_p4 = scmp.eq.s32.totalorder %s796_s19, 0 }
  0x48   : > { %711 = dma.done.wait (%p988_p4), [#allocation6], 512   ;;  %p989_p6 = pmov %p988_p4 }
  0x49   : > { %s896_s23 = scalar_lea.vmem [#allocation7], %s479_s30  ;;  %p990_p9 = scmp.ne.s32.totalorder %s796_s19, 0 }
  0x4a   : > { %713 = vsyncadd (%p989_p6), [#allocation6], 4294966784 }
  0x4b   : > { %230 = sbr.rel (%p990_p9) target bundleno = 82 (0x52), region = 44 }
  0x50   : > { %vm231_vm0 = vcmask 257024   ;;  %v742_v0 = vmov 0.0  }
  0x51   : > { %232 = vst.msk [vmem:[#allocation8] sm:$0xf] %vm231_vm0, %v742_v0 }
  0x52 PF: > { %v238_v1 = vld [vmem:[#allocation5 + $0x18] sm:$0xff]  ;;  %v743_v2 = vmov 0.0   ;;  %v237_v3 = vld [vmem:[#allocation5 + $0x10] sm:$0xff]  ;;  %vm744_vm1 = vmmov 0   ;;  %v236_v4 = vld [vmem:[#allocation5 + $0x8] sm:$0xff]  ;;  %vm246_vm2 = vcmask 261120  }
  0x53   : > { %497 = vmatprep.subr.mxu0 %v743_v2  ;;  %505 = vmatprep.mubr.msk.f32.mxu0 %vm744_vm1, %v743_v2  ;;  %v235_v5 = vld [vmem:[#allocation5] sm:$0xff]  ;;  %v483_v7 = vld [vmem:[%s972_s2] ss:$0 sm:$0xff]  ;;  %s745_s26 = smov 64   ;;  %s746_s28 = smov 96   ;;  %vm353_vm3 = vcmask 257024  }
  0x54   : > { %498 = vmatpush3.msra.mxu0 %v238_v1  ;;  %v233_v11 = vld [vmem:[%s886_s6] sm:$0xf]  ;;  %s747_s29 = smov 32   ;;  %s487_s7 = sshll.u32 %s796_s19, 6 }
  0x55   : > { %499 = vmatprep.subr.mxu0 %v743_v2  ;;  %s370_s8 = sshll.u32 %s896_s23, 4  ;;  %s748_s12 = smov [#allocation8]   ;;  %s911_s8 = int_to_ptr.vmem [resolvable:$true] %s370_s8 }
  0x56   : > { %500 = vmatpush3.msra.mxu0 %v237_v3  ;;  %s381_s13 = sshll.u32 %s748_s12, 4  ;;  %s909_s20 = scalar_lea.hbm %s973_s3, %s487_s7  ;;  %s913_s13 = int_to_ptr.vmem [resolvable:$true] %s381_s13 }
  0x57   : > { %501 = vmatprep.subr.mxu0 %v743_v2  ;;  %s357_s30 = scalar_lea.sflag [#allocation4], %s882_s25  ;;  %s640_s5 = scalar_lea.vmem %s911_s8, 64 }
  0x58   : > { %502 = vmatpush3.msra.mxu0 %v236_v4  ;;  %v234_v6 = vld [vmem:[#allocation8] sm:$0xf]  ;;  %p641_p3 = scmp.ne.s32.totalorder %s911_s8, %s640_s5  ;;  %p991_p11 = scmp.ne.s32.totalorder %s984_s10, 0 }
  0x59   : > { %503 = vmatprep.subr.mxu0 %v743_v2  ;;  %s749_s6 = smov [#allocation7]  }
  0x5a   : > { %504 = vmatpush3.msra.mxu0 %v235_v5  ;;  %p642_p7 = pnand %p641_p3, %p991_p11  ;;  %s644_s21 = sshll.u32 %s749_s6, 4  ;;  %s645_s21 = int_to_ptr.vmem [resolvable:$false] %s644_s21 }
  0x5b   : > { %506 = vmatmul.mubr.msk.f32.vlgmr.msra.gmra.mxu0 %vm246_vm2, %v234_v6  ;;  %s646_s24 = scalar_lea.vmem %s645_s21, 128  ;;  %p647_p2 = scmp.lt.s32.totalorder %s911_s8, %s645_s21 }
  0x5c   : > { %p643_p8 = pneg %p642_p7  ;;  %p648_p13 = scmp.lt.s32.totalorder %s646_s24, %s640_s5 }
  0x5e   : > { %p649_p0 = por %p648_p13, %p647_p2 }
  0x60   : > { %p650_p5 = pnand %p649_p0, %p643_p8 }
 0x11b   : > { %v316_v8 = vpop.f32.mrf.mxu0 }
 0x11c   : > { %v317_v9 = vadd.f32 %v483_v7, %v316_v8 }
 0x11d   : > { %v507_v10 = vpop.f32.mrf.mxu0 }
 0x11e   : > { %328 = vrot.lane.b32.xlu0 %v317_v9, %s745_s26  ;;  %v320_v12 = vadd.f32 %v317_v9, %v233_v11 }
 0x120   : > { %v485_v13 = vmul.f32 -1.442695, %v320_v12 }
 0x122   : > { %580 = vpow2.f32 %v485_v13 }
 0x12f   : > { %v581_v14 = vpop.eup %580 }
 0x130   : > { %v324_v15 = vadd.f32 1.0, %v581_v14 }
 0x132   : > { %582 = vrcp.f32 %v324_v15 }
 0x13f   : > { %v583_v16 = vpop.eup %582 }
 0x140   : > { %v338_v23 = vsub.f32 1.0, %v583_v16 }
 0x190   : > { %v329_v17 = vpop.permute.xlu0 %328 }
 0x191   : > { %v331_v18 = vmul.f32 %v583_v16, %v329_v17 }
 0x193   : > { %333 = vrot.lane.b32.xlu0 %v331_v18, %s745_s26 }
 0x205   : > { %v334_v19 = vpop.permute.xlu0 %333 }
 0x206   : > { %v336_v20 = vadd.f32 %v334_v19, %v233_v11 }
 0x208   : > { %584 = vtanh.f32 %v336_v20 }
 0x215   : > { %v585_v21 = vpop.eup %584 }
 0x216   : > { %340 = vrot.lane.b32.xlu1 %v585_v21, %s746_s28 }
 0x21a   : > { %344 = vrot.lane.b32.xlu1 %v234_v6, %s747_s29 }
 0x288   : > { %v341_v22 = vpop.permute.xlu1 %340 }
 0x289   : > { %v343_v25 = vmul.f32 %v341_v22, %v338_v23 }
 0x28c   : > { %v345_v24 = vpop.permute.xlu1 %344 }
 0x28d   : > { %v347_v26 = vmul.f32 %v583_v16, %v345_v24 }
 0x28f   : > { %v348_v27 = vadd.f32 %v347_v26, %v343_v25 }
 0x291   : > { %350 = vrot.lane.b32.xlu0 %v348_v27, %s746_s28 }
 0x303   : > { %v351_v28 = vpop.permute.xlu0 %350 }
 0x304   : > { %355 = vst.msk [vmem:[%s896_s23] sm:$0xf] %vm353_vm3, %v351_v28  ;;  %354 = vst.msk [vmem:[#allocation8] sm:$0xf] %vm353_vm3, %v351_v28 }
 0x305   : > { %653 = shalt.err (!%p650_p5)
}
 0x306   : > { %s654_s23 = scalar_lea.hbm %s909_s20, 64  ;;  %s658_s28 = scalar_lea.hbm %s973_s3, 512 }
 0x307   : > { %p655_p10 = scmp.ne.s32.totalorder %s909_s20, %s654_s23  ;;  %p659_p4 = scmp.lt.s32.totalorder %s909_s20, %s973_s3 }
 0x308   : > { %p660_p6 = scmp.lt.s32.totalorder %s658_s28, %s654_s23 }
 0x309   : > { %p656_p12 = pnand %p655_p10, %p991_p11 }
 0x30a   : > { %p661_p9 = por %p660_p6, %p659_p4 }
 0x30b   : > { %p657_p1 = pneg %p656_p12 }
 0x30d   : > { %p662_p3 = pnand %p661_p9, %p657_p1 }
 0x30f   : > { %665 = shalt.err (!%p662_p3)
}
 0x310   : > { %514 = dma.vmem_to_hbm [thread:$0]  (%p991_p11), %s911_s8, 64, %s909_s20, %s357_s30  }
 0x311   : > { %s666_s12 = scalar_lea.vmem %s913_s13, 64  ;;  %p992_p8 = scmp.eq.s32.totalorder %s796_s19, 7 }
 0x312   : > { %p667_p7 = scmp.ne.s32.totalorder %s913_s13, %s666_s12  ;;  %p673_p0 = scmp.lt.s32.totalorder %s913_s13, %s913_s13 }
 0x313   : > { %p674_p5 = scmp.lt.s32.totalorder %s666_s12, %s666_s12 }
 0x314   : > { %p668_p2 = pnand %p667_p7, %p992_p8 }
 0x315   : > { %p675_p10 = por %p674_p5, %p673_p0 }
 0x316   : > { %p669_p13 = pneg %p668_p2 }
 0x318   : > { %p676_p12 = pnand %p675_p10, %p669_p13 }
 0x31a   : > { %679 = shalt.err (!%p676_p12)
}
 0x31b   : > { %p993_p1 = pmov %p992_p8 }
 0x31d   : > { %516 = dma.vmem_to_hbm [thread:$0]  (%p993_p1), %s913_s13, 64, %s974_s4, [#allocation9]  }
 0x31e   : > { %p994_p11 = pmov %p993_p1 }
 0x31f   : > { %p995_p4 = pmov %p993_p1 }
 0x320   : > { %715 = dma.done.wait (%p994_p11), [#allocation9], 64  }
 0x321   : > { %717 = vsyncadd (%p995_p4), [#allocation9], 4294967232 }
 0x322 PF: > { %p537_p6 = scmp.ge.s32.totalorder %s736_s18, 2  ;;  %s397_s8 = sand.u32 1, %s724_s15  }
 0x323   : > { %p996_p9 = scmp.ne.s32.totalorder %s980_s22, 0  ;;  %s398_s14 = scalar_lea.sflag [#allocation4], %s397_s8 }
 0x325   : > { %p529_p3 = pnand %p537_p6, %p996_p9 }
 0x327   : > { %p530_p7 = pneg %p529_p3 }
 0x329   : > { %719 = dma.done.wait (%p530_p7), %s398_s14, 64  }
 0x32a   : > { %721 = vsyncadd (%p530_p7), %s398_s14, 4294967232  ;;  %p20_p8 = scmp.ge.s32.totalorder %s829_s27, 10   ;;  %s997_s15 = smov %s728_s16 }
 0x32b   : > { %s998_s16 = smov %s732_s17  ;;  %s999_s17 = smov %s846_s9 }
 0x32c   : > { %s1000_s18 = smov %s829_s27  ;;  %22 = sbr.rel (!%p20_p8) target bundleno = 7 (0x7), region = 93 }
 0x331   :  { %403 = vsyncpa [#allocation3], 1 }
 0x332   :  { %405 = vsyncpa [#allocation3 + $0x1], 1 }
 0x333   :  { %406 = vsyncpa [#allocation6], 1 }
 0x334   :  { %407 = vsyncpa [#allocation4], 1 }
 0x335   :  { %409 = vsyncpa [#allocation4 + $0x1], 1 }
 0x336   :  { %410 = vsyncpa [#allocation9], 1 }

</bundles_post_ra>
